<compile_context>
chip_gen: v7x
topology: tpu7x:2x2x1
jax: 0.10.0
libtpu: 0.0.40
codegen_flags: <defaults>
</compile_context>

<pallas_src>
import jax
import jax.numpy as jnp
from jax.experimental import pallas as pl
from jax.experimental.pallas import tpu as pltpu


def _round_up(x, m):
    return ((x + m - 1) // m) * m


def mlpn_kernel(x_ref,
                w1_ref, b1_ref,
                w2_ref, b2_ref,
                w3_ref, b3_ref,
                w4_ref, b4_ref,
                o_ref):
    # --- hidden layers: bf16 operands -> MXU, f32 accumulate, f32 bias+ReLU ---
    h = jnp.dot(x_ref[...].astype(jnp.bfloat16), w1_ref[...],
                preferred_element_type=jnp.float32) + b1_ref[...]
    h = jnp.maximum(h, 0.0)

    h = jnp.dot(h.astype(jnp.bfloat16), w2_ref[...],
                preferred_element_type=jnp.float32) + b2_ref[...]
    h = jnp.maximum(h, 0.0)

    h = jnp.dot(h.astype(jnp.bfloat16), w3_ref[...],
                preferred_element_type=jnp.float32) + b3_ref[...]
    h = jnp.maximum(h, 0.0)

    # --- final 64 -> 1 layer (no activation) ---
    # A (TILE_N, 64) @ (64, 1) matmul wastes the MXU and forces a lane-sparse
    # (TILE_N, 1) store.  Do it on the VPU/XLU instead: elementwise multiply by
    # the (1, 64) weight row and reduce over the lane axis, emitting directly
    # into the lane-dense (TILE_N // 128, 128) output slab.
    tile_n, hid = h.shape                      # tile_n is a multiple of 128
    hr = h.reshape(tile_n // 128, 128, hid)    # layout no-op: lane dim unchanged
    y = jnp.sum(hr * w4_ref[...], axis=-1) + b4_ref[...]   # (tile_n//128, 128)
    o_ref[...] = y.astype(o_ref.dtype)


def mlpn_forward(x, params, tile_n=1024):
    """x: (N, 32) float32. params: list of (W, b) with W as (in, out), f32."""
    (w1, b1), (w2, b2), (w3, b3), (w4, b4) = params
    n, in_dim = x.shape
    assert w4.shape[1] == 1, "final layer is expected to be (..., 1)"

    # Tile must be a multiple of 128 (128 rows per lane-row of the output slab).
    tn = min(_round_up(tile_n, 128), _round_up(n, 128))
    n_pad = _round_up(n, tn)
    if n_pad // tn > 1 and tn % 1024 != 0:
        # multi-tile path: keep (tn // 128) a multiple of 8 for clean out blocks
        tn = _round_up(tn, 1024)
        n_pad = _round_up(n, tn)
    if n_pad != n:
        x = jnp.pad(x, ((0, n_pad - n), (0, 0)))
    grid = (n_pad // tn,)

    # bf16 MXU operands for the hidden layers (cast once, in the wrapper);
    # final layer stays f32 (VPU path, v5e has no bf16 VPU).
    w1b, w2b, w3b = (w.astype(jnp.bfloat16) for w in (w1, w2, w3))
    w4row = w4.reshape(1, -1).astype(jnp.float32)   # (1, 64)
    b4s = b4.reshape(1, 1).astype(jnp.float32)      # (1, 1)

    def resident(arr):  # full-array block, constant index_map -> stays in VMEM
        return pl.BlockSpec(arr.shape, lambda i: (0, 0))

    dims = [in_dim, w1.shape[1], w2.shape[1], w3.shape[1], 1]
    flops = 2 * n_pad * sum(a * b for a, b in zip(dims[:-1], dims[1:]))
    param_bytes = (w1b.size + w2b.size + w3b.size) * 2 + \
                  (w4row.size + b1.size + b2.size + b3.size + b4s.size) * 4
    bytes_accessed = n_pad * in_dim * 4 + n_pad * 4 + param_bytes

    out = pl.pallas_call(
        mlpn_kernel,
        out_shape=jax.ShapeDtypeStruct((n_pad // 128, 128), jnp.float32),
        grid=grid,
        in_specs=[
            pl.BlockSpec((tn, in_dim), lambda i: (i, 0)),   # x: pipelined
            resident(w1b), resident(b1),
            resident(w2b), resident(b2),
            resident(w3b), resident(b3),
            resident(w4row), resident(b4s),
        ],
        out_specs=pl.BlockSpec((tn // 128, 128), lambda i: (i, 0)),
        compiler_params=pltpu.CompilerParams(
            dimension_semantics=("parallel",)),
        cost_estimate=pl.CostEstimate(flops=flops, transcendentals=0,
                                      bytes_accessed=bytes_accessed),
    )(x, w1b, b1, w2b, b2, w3b, b3, w4row, b4s)

    # lane-dense slab -> (N, 1)
    return out.reshape(n_pad, 1)[:n]


def init_params(key, mlp_in_dim=32, hid_dims=(64, 128, 64), mlp_out_dim=1):
    """Deterministic synthetic init matching MLPN's parameter shapes.

    Linear weights ~ N(0, 0.02) (weights_init); biases use PyTorch's default
    uniform(-1/sqrt(fan_in), 1/sqrt(fan_in)).
    """
    dims = [mlp_in_dim] + list(hid_dims) + [mlp_out_dim]
    params = []
    for i in range(len(dims) - 1):
        in_d, out_d = dims[i], dims[i + 1]
        key, kw, kb = jax.random.split(key, 3)
        w = 0.02 * jax.random.normal(kw, (in_d, out_d), dtype=jnp.float32)
        bound = 1.0 / (in_d ** 0.5)
        b = jax.random.uniform(kb, (1, out_d), minval=-bound, maxval=bound,
                               dtype=jnp.float32)
        params.append((w, b))
    return params


def mlpn_reference(x, params):
    h = x
    n_layers = len(params)
    for i, (w, b) in enumerate(params):
        h = h @ w + b
        if i < n_layers - 1:
            h = jnp.maximum(h, 0.0)
    return h


if __name__ == "__main__":
    key = jax.random.PRNGKey(0)
    key, kx = jax.random.split(key)

    params = init_params(key)

    # Small-shape check (single grid step, padded batch).
    batch = 8
    x = jax.random.normal(kx, (batch, 32), dtype=jnp.float32)
    out = jax.block_until_ready(mlpn_forward(x, params))
    ref = mlpn_reference(x, params)
    assert out.shape == (batch, 1), out.shape
    assert jnp.allclose(out, ref, atol=5e-3, rtol=1e-2), \
        f"max abs err {jnp.max(jnp.abs(out - ref))}"

    # Multi-tile check (grid > 1, ragged batch -> exercises padding path).
    key, kx2 = jax.random.split(key)
    x2 = jax.random.normal(kx2, (2600, 32), dtype=jnp.float32)
    out2 = jax.block_until_ready(mlpn_forward(x2, params))
    ref2 = mlpn_reference(x2, params)
    assert out2.shape == (2600, 1), out2.shape
    assert jnp.allclose(out2, ref2, atol=5e-3, rtol=1e-2), \
        f"max abs err {jnp.max(jnp.abs(out2 - ref2))}"

    print("KERNEL_OK")
</pallas_src>

<mosaic_0001>
module attributes {stable_mosaic.version = 11 : i64} {
  func.func @mlpn_kernel(%arg0: i32, %arg1: memref<128x32xf32, #tpu.memory_space<vmem>>, %arg2: memref<32x64xbf16, #tpu.memory_space<vmem>>, %arg3: memref<1x64xf32, #tpu.memory_space<vmem>>, %arg4: memref<64x128xbf16, #tpu.memory_space<vmem>>, %arg5: memref<1x128xf32, #tpu.memory_space<vmem>>, %arg6: memref<128x64xbf16, #tpu.memory_space<vmem>>, %arg7: memref<1x64xf32, #tpu.memory_space<vmem>>, %arg8: memref<1x64xf32, #tpu.memory_space<vmem>>, %arg9: memref<1x1xf32, #tpu.memory_space<vmem>>, %arg10: memref<1x128xf32, #tpu.memory_space<vmem>>) attributes {dimension_semantics = [#tpu.dimension_semantics<parallel>], iteration_bounds = array<i64: 1>, scalar_prefetch = 0 : i64, scratch_operands = 0 : i64, tpu.core_type = #tpu.core_type<tc>, window_params = [{transform_indices = @transform_0, window_bounds = array<i64: 128, 32>}, {pipeline_mode = #tpu.pipeline_mode<synchronous>, transform_indices = @transform_1, window_bounds = array<i64: 32, 64>}, {pipeline_mode = #tpu.pipeline_mode<synchronous>, transform_indices = @transform_2, window_bounds = array<i64: 1, 64>}, {pipeline_mode = #tpu.pipeline_mode<synchronous>, transform_indices = @transform_3, window_bounds = array<i64: 64, 128>}, {pipeline_mode = #tpu.pipeline_mode<synchronous>, transform_indices = @transform_4, window_bounds = array<i64: 1, 128>}, {pipeline_mode = #tpu.pipeline_mode<synchronous>, transform_indices = @transform_5, window_bounds = array<i64: 128, 64>}, {pipeline_mode = #tpu.pipeline_mode<synchronous>, transform_indices = @transform_6, window_bounds = array<i64: 1, 64>}, {pipeline_mode = #tpu.pipeline_mode<synchronous>, transform_indices = @transform_7, window_bounds = array<i64: 1, 64>}, {pipeline_mode = #tpu.pipeline_mode<synchronous>, transform_indices = @transform_8, window_bounds = array<i64: 1, 1>}, {transform_indices = @transform_9, window_bounds = array<i64: 1, 128>}]} {
    %c0 = arith.constant 0 : index
    %c0_0 = arith.constant 0 : index
    %0 = vector.load %arg1[%c0, %c0_0] : memref<128x32xf32, #tpu.memory_space<vmem>>, vector<128x32xf32>
    %1 = arith.truncf %0 : vector<128x32xf32> to vector<128x32xbf16>
    %c0_1 = arith.constant 0 : index
    %c0_2 = arith.constant 0 : index
    %2 = vector.load %arg2[%c0_1, %c0_2] : memref<32x64xbf16, #tpu.memory_space<vmem>>, vector<32x64xbf16>
    %cst = arith.constant dense<0.000000e+00> : vector<128x64xf32>
    %3 = tpu.matmul %1, %2, %cst {dimension_numbers = #tpu.dot_dimension_numbers<[1], [0], [0], [1], [0, 0, 1, 1], [], []>} : vector<128x32xbf16>, vector<32x64xbf16>, vector<128x64xf32> -> vector<128x64xf32>
    %c0_3 = arith.constant 0 : index
    %c0_4 = arith.constant 0 : index
    %4 = vector.load %arg3[%c0_3, %c0_4] : memref<1x64xf32, #tpu.memory_space<vmem>>, vector<1x64xf32>
    %5 = vector.broadcast %4 : vector<1x64xf32> to vector<128x64xf32>
    %6 = arith.addf %3, %5 : vector<128x64xf32>
    %cst_5 = arith.constant 0.000000e+00 : f32
    %7 = vector.broadcast %cst_5 : f32 to vector<128x64xf32>
    %8 = arith.maximumf %6, %7 : vector<128x64xf32>
    %9 = arith.truncf %8 : vector<128x64xf32> to vector<128x64xbf16>
    %c0_6 = arith.constant 0 : index
    %c0_7 = arith.constant 0 : index
    %10 = vector.load %arg4[%c0_6, %c0_7] : memref<64x128xbf16, #tpu.memory_space<vmem>>, vector<64x128xbf16>
    %cst_8 = arith.constant dense<0.000000e+00> : vector<128x128xf32>
    %11 = tpu.matmul %9, %10, %cst_8 {dimension_numbers = #tpu.dot_dimension_numbers<[1], [0], [0], [1], [0, 0, 1, 1], [], []>} : vector<128x64xbf16>, vector<64x128xbf16>, vector<128x128xf32> -> vector<128x128xf32>
    %c0_9 = arith.constant 0 : index
    %c0_10 = arith.constant 0 : index
    %12 = vector.load %arg5[%c0_9, %c0_10] : memref<1x128xf32, #tpu.memory_space<vmem>>, vector<1x128xf32>
    %13 = vector.broadcast %12 : vector<1x128xf32> to vector<128x128xf32>
    %14 = arith.addf %11, %13 : vector<128x128xf32>
    %cst_11 = arith.constant 0.000000e+00 : f32
    %15 = vector.broadcast %cst_11 : f32 to vector<128x128xf32>
    %16 = arith.maximumf %14, %15 : vector<128x128xf32>
    %17 = arith.truncf %16 : vector<128x128xf32> to vector<128x128xbf16>
    %c0_12 = arith.constant 0 : index
    %c0_13 = arith.constant 0 : index
    %18 = vector.load %arg6[%c0_12, %c0_13] : memref<128x64xbf16, #tpu.memory_space<vmem>>, vector<128x64xbf16>
    %cst_14 = arith.constant dense<0.000000e+00> : vector<128x64xf32>
    %19 = tpu.matmul %17, %18, %cst_14 {dimension_numbers = #tpu.dot_dimension_numbers<[1], [0], [0], [1], [0, 0, 1, 1], [], []>} : vector<128x128xbf16>, vector<128x64xbf16>, vector<128x64xf32> -> vector<128x64xf32>
    %c0_15 = arith.constant 0 : index
    %c0_16 = arith.constant 0 : index
    %20 = vector.load %arg7[%c0_15, %c0_16] : memref<1x64xf32, #tpu.memory_space<vmem>>, vector<1x64xf32>
    %21 = vector.broadcast %20 : vector<1x64xf32> to vector<128x64xf32>
    %22 = arith.addf %19, %21 : vector<128x64xf32>
    %cst_17 = arith.constant 0.000000e+00 : f32
    %23 = vector.broadcast %cst_17 : f32 to vector<128x64xf32>
    %24 = arith.maximumf %22, %23 : vector<128x64xf32>
    %25 = vector.shape_cast %24 : vector<128x64xf32> to vector<1x128x64xf32>
    %c0_18 = arith.constant 0 : index
    %c0_19 = arith.constant 0 : index
    %26 = vector.load %arg8[%c0_18, %c0_19] : memref<1x64xf32, #tpu.memory_space<vmem>>, vector<1x64xf32>
    %27 = vector.shape_cast %26 : vector<1x64xf32> to vector<1x1x64xf32>
    %28 = vector.broadcast %27 : vector<1x1x64xf32> to vector<1x128x64xf32>
    %29 = arith.mulf %25, %28 : vector<1x128x64xf32>
    %cst_20 = arith.constant dense<0.000000e+00> : vector<1x128xf32>
    %30 = vector.multi_reduction <add>, %29, %cst_20 [2] : vector<1x128x64xf32> to vector<1x128xf32>
    %c0_21 = arith.constant 0 : index
    %c0_22 = arith.constant 0 : index
    %31 = vector.load %arg9[%c0_21, %c0_22] : memref<1x1xf32, #tpu.memory_space<vmem>>, vector<1x1xf32>
    %32 = vector.broadcast %31 : vector<1x1xf32> to vector<1x128xf32>
    %33 = arith.addf %30, %32 : vector<1x128xf32>
    %c0_23 = arith.constant 0 : index
    %c0_24 = arith.constant 0 : index
    %34 = vector.load %arg10[%c0_23, %c0_24] : memref<1x128xf32, #tpu.memory_space<vmem>>, vector<1x128xf32>
    tpu.vector_store %arg10[%c0_23, %c0_24], %33 {strides = array<i32>} : memref<1x128xf32, #tpu.memory_space<vmem>>, vector<1x128xf32>,
    return
  }
  func.func @transform_0(%arg0: i32) -> (i32, i32) {
    %c0_i32 = arith.constant 0 : i32
    %c0_i32_0 = arith.constant 0 : i32
    return %arg0, %c0_i32 : i32, i32
  }
  func.func @transform_1(%arg0: i32) -> (i32, i32) {
    %c0_i32 = arith.constant 0 : i32
    %c0_i32_0 = arith.constant 0 : i32
    %c0_i32_1 = arith.constant 0 : i32
    return %c0_i32, %c0_i32_0 : i32, i32
  }
  func.func @transform_2(%arg0: i32) -> (i32, i32) {
    %c0_i32 = arith.constant 0 : i32
    %c0_i32_0 = arith.constant 0 : i32
    %c0_i32_1 = arith.constant 0 : i32
    return %c0_i32, %c0_i32_0 : i32, i32
  }
  func.func @transform_3(%arg0: i32) -> (i32, i32) {
    %c0_i32 = arith.constant 0 : i32
    %c0_i32_0 = arith.constant 0 : i32
    %c0_i32_1 = arith.constant 0 : i32
    return %c0_i32, %c0_i32_0 : i32, i32
  }
  func.func @transform_4(%arg0: i32) -> (i32, i32) {
    %c0_i32 = arith.constant 0 : i32
    %c0_i32_0 = arith.constant 0 : i32
    %c0_i32_1 = arith.constant 0 : i32
    return %c0_i32, %c0_i32_0 : i32, i32
  }
  func.func @transform_5(%arg0: i32) -> (i32, i32) {
    %c0_i32 = arith.constant 0 : i32
    %c0_i32_0 = arith.constant 0 : i32
    %c0_i32_1 = arith.constant 0 : i32
    return %c0_i32, %c0_i32_0 : i32, i32
  }
  func.func @transform_6(%arg0: i32) -> (i32, i32) {
    %c0_i32 = arith.constant 0 : i32
    %c0_i32_0 = arith.constant 0 : i32
    %c0_i32_1 = arith.constant 0 : i32
    return %c0_i32, %c0_i32_0 : i32, i32
  }
  func.func @transform_7(%arg0: i32) -> (i32, i32) {
    %c0_i32 = arith.constant 0 : i32
    %c0_i32_0 = arith.constant 0 : i32
    %c0_i32_1 = arith.constant 0 : i32
    return %c0_i32, %c0_i32_0 : i32, i32
  }
  func.func @transform_8(%arg0: i32) -> (i32, i32) {
    %c0_i32 = arith.constant 0 : i32
    %c0_i32_0 = arith.constant 0 : i32
    %c0_i32_1 = arith.constant 0 : i32
    return %c0_i32, %c0_i32_0 : i32, i32
  }
  func.func @transform_9(%arg0: i32) -> (i32, i32) {
    %c0_i32 = arith.constant 0 : i32
    %c0_i32_0 = arith.constant 0 : i32
    return %arg0, %c0_i32 : i32, i32
  }
}

</mosaic_0001>

<bundles_post_ra>
// kernel: tpu_custom_call.1
= control target key start
LH: loop header
LB: loop body
LE: loop exit
PB: predicated region body
PF: predicated region fallthrough
CT: control target
= control target key end

     0   :  { %s1375_s0 = inlined_call_operand.vmem [shape: f32[128,32], index: 0, kind: input, shape index: {}]   ;;  %s1376_s1 = inlined_call_operand.vmem [shape: bf16[32,64], index: 1, kind: input, shape index: {}]   ;;  %s1377_s2 = inlined_call_operand.vmem [shape: f32[1,64], index: 2, kind: input, shape index: {}]   ;;  %s1378_s3 = inlined_call_operand.vmem [shape: bf16[64,128], index: 3, kind: input, shape index: {}]   ;;  %s1379_s4 = inlined_call_operand.vmem [shape: f32[1,128], index: 4, kind: input, shape index: {}]   ;;  %s1380_s5 = inlined_call_operand.vmem [shape: bf16[128,64], index: 5, kind: input, shape index: {}]   ;;  %s1381_s6 = inlined_call_operand.vmem [shape: f32[1,64], index: 6, kind: input, shape index: {}]   ;;  %s1382_s7 = inlined_call_operand.vmem [shape: f32[1,64], index: 7, kind: input, shape index: {}]   ;;  %s1383_s8 = inlined_call_operand.<no memory space> [shape: f32[1,1], index: 8, kind: input, shape index: {}]   ;;  %s1384_s9 = inlined_call_operand.hbm [shape: f32[1,128], index: 9, kind: output, shape index: {}]  }
   0x1   :  { %v14_v0 = vstv %s1383_s8 }
   0x2   :  { %15 = vst [vmem:[#allocation2] sm:$0x1] %v14_v0 }
   0x3   :  { %v1006_v1 = vld [vmem:[%s1376_s1] sm:$0xff]   ;;  %v1007_v2 = vld [vmem:[%s1376_s1 + $0x8] sm:$0xff]   ;;  %vm83_vm0 = vcmask 261120   ;;  %v38_v6 = vld [vmem:[%s1375_s0 + $0x10] sm:$0xff] }
   0x4   :  { %910 = vmatprep.subr.bf16.mxu0 %v1006_v1  ;;  %v36_v3 = vld [vmem:[%s1375_s0] sm:$0xff]  ;;  %v37_v4 = vld [vmem:[%s1375_s0 + $0x8] sm:$0xff]  ;;  %v39_v7 = vld [vmem:[%s1375_s0 + $0x18] sm:$0xff] }
   0x5   :  { %911 = vmatpush3.bf16.msra.mxu0 %v1006_v1  ;;  %v52_v5 = vpack.c.bf16 %v37_v4, %v36_v3  ;;  %v40_v8 = vld [vmem:[%s1375_s0 + $0x20] sm:$0xff]  ;;  %v41_v9 = vld [vmem:[%s1375_s0 + $0x28] sm:$0xff]  ;;  %v53_v10 = vpack.c.bf16 %v39_v7, %v38_v6  ;;  %v42_v13 = vld [vmem:[%s1375_s0 + $0x30] sm:$0xff] }
   0x6   :  { %912 = vmatprep.subr.bf16.mxu0 %v1007_v2  ;;  %v54_v11 = vpack.c.bf16 %v41_v9, %v40_v8  ;;  %v1008_v12 = vld [vmem:[%s1378_s3] sm:$0xff]   ;;  %v43_v14 = vld [vmem:[%s1375_s0 + $0x38] sm:$0xff]  ;;  %v1009_v15 = vld [vmem:[%s1378_s3 + $0x8] sm:$0xff]  }
   0x7   :  { %914 = vmatprep.mubr.msk.bf16.mxu0 %vm83_vm0, %v52_v5  ;;  %v44_v16 = vld [vmem:[%s1375_s0 + $0x40] sm:$0xff]  ;;  %v45_v17 = vld [vmem:[%s1375_s0 + $0x48] sm:$0xff]  ;;  %930 = vmatprep.subr.bf16.mxu1 %v1008_v12  ;;  %v55_v18 = vpack.c.bf16 %v43_v14, %v42_v13 }
   0x8   :  { %931 = vmatpush3.bf16.msra.mxu1 %v1008_v12  ;;  %v56_v19 = vpack.c.bf16 %v45_v17, %v44_v16 }
   0x9   :  { %913 = vmatpush3.bf16.msra.mxu0 %v1007_v2  ;;  %932 = vmatprep.subr.bf16.mxu1 %v1009_v15 }
   0xc   :  { %915 = vmatmul.mubr.msk.bf16.vlgmr.msra.gmra.mrb[0].mxu0 %vm83_vm0, %v53_v10  ;;  %933 = vmatpush3.bf16.msra.mxu1 %v1009_v15 }
   0xd   :  { %918 = vmatprep.mubr.msk.bf16.mxu0 %vm83_vm0, %v54_v11 }
   0xe   :  { %16 = vsyncpa [#allocation4], 0  ;;  %v46_v20 = vld [vmem:[%s1375_s0 + $0x50] sm:$0xff]  ;;  %v47_v21 = vld [vmem:[%s1375_s0 + $0x58] sm:$0xff]  ;;  %vm268_vm1 = vcmask 523264   ;;  %vm722_vm2 = vcmask 130112  }
   0xf   :  { %v48_v22 = vld [vmem:[%s1375_s0 + $0x60] sm:$0xff]  ;;  %v49_v23 = vld [vmem:[%s1375_s0 + $0x68] sm:$0xff]  ;;  %v57_v24 = vpack.c.bf16 %v47_v21, %v46_v20  ;;  %v50_v26 = vld [vmem:[%s1375_s0 + $0x70] sm:$0xff]  ;;  %vm729_vm3 = vcmask 195712   ;;  %vm736_vm4 = vcmask 261312   ;;  %vm743_vm5 = vcmask 326912  }
  0x10   :  { %v58_v25 = vpack.c.bf16 %v49_v23, %v48_v22  ;;  %v51_v27 = vld [vmem:[%s1375_s0 + $0x78] sm:$0xff]  ;;  %v1010_v29 = vld [vmem:[%s1378_s3 + $0x10] sm:$0xff]   ;;  %v1012_v31 = vld [vmem:[%s1380_s5] sm:$0xff]   ;;  %vm750_vm6 = vcmask 392512   ;;  %vm757_vm7 = vcmask 458112   ;;  %vm764_vm8 = vcmask 523712  }
  0x11   :  { %v59_v28 = vpack.c.bf16 %v51_v27, %v50_v26  ;;  %934 = vmatprep.subr.bf16.mxu1 %v1010_v29  ;;  %v1011_v30 = vld [vmem:[%s1378_s3 + $0x18] sm:$0xff]   ;;  %v1013_v32 = vld [vmem:[%s1380_s5 + $0x8] sm:$0xff]   ;;  %954 = vmatprep.subr.bf16.mxu0 %v1012_v31  ;;  %v1014_v33 = vld [vmem:[%s1380_s5 + $0x10] sm:$0xff]   ;;  %vm771_vm9 = vcmask 589312   ;;  %vm778_vm10 = vcmask 654912   ;;  %vm785_vm11 = vcmask 720512  }
  0x12   :  { %935 = vmatpush3.bf16.msra.mxu1 %v1010_v29  ;;  %955 = vmatpush3.bf16.msra.mxu0 %v1012_v31  ;;  %v1185_v34 = vld [vmem:[%s1380_s5 + $0x18] sm:$0xff]   ;;  %v1191_v35 = vld [vmem:[%s1380_s5 + $0x20] sm:$0xff]   ;;  %v1198_v36 = vld [vmem:[%s1380_s5 + $0x28] sm:$0xff]   ;;  %vm792_vm12 = vcmask 786112   ;;  %vm799_vm13 = vcmask 851712   ;;  %vm806_vm14 = vcmask 917312  }
  0x13   :  { %936 = vmatprep.subr.bf16.mxu1 %v1011_v30  ;;  %956 = vmatprep.subr.bf16.mxu0 %v1013_v32  ;;  %v1206_v37 = vld [vmem:[%s1377_s2] ss:$0 sm:$0xff]  ;;  %vm813_vm15 = vcmask 982912  }
  0x14   :  { %919 = vmatmul.mubr.msk.bf16.gmra.mrb[4].mxu0 %vm83_vm0, %v55_v18 }
  0x15   :  { %922 = vmatprep.mubr.msk.bf16.mxu0 %vm83_vm0, %v56_v19 }
  0x16   :  { %937 = vmatpush3.bf16.msra.mxu1 %v1011_v30  ;;  %957 = vmatpush3.bf16.msra.mxu0 %v1013_v32  ;;  %v1018_v30 = vld [vmem:[%s1380_s5 + $0x30] sm:$0xff]  }
  0x17   :  { %986 = vmatprep.subr.bf16.mxu1 %v1012_v31  ;;  %958 = vmatprep.subr.bf16.mxu0 %v1014_v33 }
  0x1a   :  { %959 = vmatpush3.bf16.msra.mxu0 %v1014_v33 }
  0x1b   :  { %960 = vmatprep.subr.bf16.mxu0 %v1185_v34 }
  0x1c   :  { %923 = vmatmul.mubr.msk.bf16.gmra.mrb[8].mxu0 %vm83_vm0, %v57_v24 }
  0x1d   :  { %926 = vmatprep.mubr.msk.bf16.mxu0 %vm83_vm0, %v58_v25 }
  0x1e   :  { %961 = vmatpush3.bf16.msra.mxu0 %v1185_v34 }
  0x1f   :  { %962 = vmatprep.subr.bf16.mxu0 %v1191_v35 }
  0x22   :  { %963 = vmatpush3.bf16.msra.mxu0 %v1191_v35 }
  0x23   :  { %964 = vmatprep.subr.bf16.mxu0 %v1198_v36 }
  0x24   :  { %927 = vmatmul.mubr.msk.bf16.gmra.mrb[12].mxu0 %vm83_vm0, %v59_v28  ;;  %vm820_vm0 = vcmask 1048512  }
  0x26   :  { %965 = vmatpush3.bf16.msra.mxu0 %v1198_v36 }
  0x27   :  { %966 = vmatprep.subr.bf16.mxu0 %v1018_v30 }
  0x2a   :  { %967 = vmatpush3.bf16.msra.mxu0 %v1018_v30 }
  0xdf   :  { %v916_v38 = vpop.f32.mrb[0].mxu0 }
  0xe0   :  { %v151_v39 = vadd.f32 %v916_v38, %v1206_v37  ;;  %v142_v40 = vpop.f32.mrb[1].mxu0 }
  0xe1   :  { %v143_v41 = vadd.f32 %v1206_v37, %v142_v40  ;;  %v917_v42 = vpop.f32.mrb[2].mxu0 }
  0xe2   :  { %v154_v43 = vadd.f32 %v917_v42, %v1206_v37  ;;  %v145_v44 = vpop.f32.mrb[3].mxu0  ;;  %v207_v46 = vmax.f32 %v151_v39, 0.0 }
  0xe3   :  { %v146_v45 = vadd.f32 %v1206_v37, %v145_v44  ;;  %v205_v48 = vmax.f32 %v143_v41, 0.0 }
  0xe4   :  { %v208_v47 = vmax.f32 %v154_v43, 0.0 }
  0xe5   :  { %v206_v49 = vmax.f32 %v146_v45, 0.0 }
  0xe6   :  { %v222_v50 = vpack.c.bf16 %v208_v47, %v207_v46 }
  0xe7   :  { %v920_v51 = vpop.f32.mrb[4].mxu0  ;;  %v221_v52 = vpack.c.bf16 %v206_v49, %v205_v48 }
  0xe8   :  { %v167_v53 = vadd.f32 %v920_v51, %v1206_v37  ;;  %v158_v54 = vpop.f32.mrb[5].mxu0 }
  0xe9   :  { %v159_v55 = vadd.f32 %v1206_v37, %v158_v54  ;;  %v921_v56 = vpop.f32.mrb[6].mxu0  ;;  %938 = vmatprep.mubr.msk.bf16.mxu1 %vm268_vm1, %v221_v52 }
  0xea   :  { %v170_v57 = vadd.f32 %v921_v56, %v1206_v37  ;;  %v161_v58 = vpop.f32.mrb[7].mxu0  ;;  %939 = vmatmul.mubr.msk.bf16.vlgmr.msra.gmra.mrb[0].mxu1 %vm268_vm1, %v222_v50  ;;  %v211_v60 = vmax.f32 %v167_v53, 0.0 }
  0xeb   :  { %v162_v59 = vadd.f32 %v1206_v37, %v161_v58  ;;  %994 = vmatpush3.bf16.msra.mxu1 %v1012_v31  ;;  %v209_v62 = vmax.f32 %v159_v55, 0.0  ;;  %v1019_v31 = vld [vmem:[%s1380_s5 + $0x38] sm:$0xff]  }
  0xec   :  { %v212_v61 = vmax.f32 %v170_v57, 0.0  ;;  %987 = vmatprep.subr.bf16.mxu1 %v1013_v32  ;;  %968 = vmatprep.subr.bf16.mxu0 %v1019_v31 }
  0xed   :  { %v210_v63 = vmax.f32 %v162_v59, 0.0  ;;  %969 = vmatpush3.bf16.msra.mxu0 %v1019_v31 }
  0xee   :  { %v224_v0 = vpack.c.bf16 %v212_v61, %v211_v60 }
  0xef   :  { %v223_v1 = vpack.c.bf16 %v210_v63, %v209_v62  ;;  %v924_v2 = vpop.f32.mrb[8].mxu0  ;;  %995 = vmatpush3.bf16.msra.mxu1 %v1013_v32  ;;  %v849_v32 = vld [vmem:[%s1379_s4] ss:$0 sm:$0xff] }
  0xf0   :  { %v183_v3 = vadd.f32 %v924_v2, %v1206_v37  ;;  %v174_v4 = vpop.f32.mrb[9].mxu0  ;;  %988 = vmatprep.subr.bf16.mxu1 %v1014_v33 }
  0xf1   :  { %942 = vmatprep.mubr.msk.bf16.mxu1 %vm268_vm1, %v223_v1  ;;  %v175_v5 = vadd.f32 %v1206_v37, %v174_v4  ;;  %v925_v6 = vpop.f32.mrb[10].mxu0 }
  0xf2   :  { %943 = vmatmul.mubr.msk.bf16.gmra.mrb[4].mxu1 %vm268_vm1, %v224_v0  ;;  %v215_v7 = vmax.f32 %v183_v3, 0.0  ;;  %v186_v8 = vadd.f32 %v925_v6, %v1206_v37  ;;  %v177_v9 = vpop.f32.mrb[11].mxu0 }
  0xf3   :  { %v213_v10 = vmax.f32 %v175_v5, 0.0  ;;  %v178_v11 = vadd.f32 %v1206_v37, %v177_v9  ;;  %996 = vmatpush3.bf16.msra.mxu1 %v1014_v33 }
  0xf4   :  { %v216_v12 = vmax.f32 %v186_v8, 0.0  ;;  %989 = vmatprep.subr.bf16.mxu1 %v1185_v34 }
  0xf5   :  { %v214_v13 = vmax.f32 %v178_v11, 0.0 }
  0xf6   :  { %v226_v14 = vpack.c.bf16 %v216_v12, %v215_v7 }
  0xf7   :  { %v225_v15 = vpack.c.bf16 %v214_v13, %v213_v10  ;;  %v928_v16 = vpop.f32.mrb[12].mxu0  ;;  %997 = vmatpush3.bf16.msra.mxu1 %v1185_v34 }
  0xf8   :  { %v199_v17 = vadd.f32 %v928_v16, %v1206_v37  ;;  %v190_v18 = vpop.f32.mrb[13].mxu0  ;;  %990 = vmatprep.subr.bf16.mxu1 %v1191_v35 }
  0xf9   :  { %946 = vmatprep.mubr.msk.bf16.mxu1 %vm268_vm1, %v225_v15  ;;  %v191_v19 = vadd.f32 %v1206_v37, %v190_v18  ;;  %v929_v20 = vpop.f32.mrb[14].mxu0 }
  0xfa   :  { %947 = vmatmul.mubr.msk.bf16.gmra.mrb[8].mxu1 %vm268_vm1, %v226_v14  ;;  %v219_v21 = vmax.f32 %v199_v17, 0.0  ;;  %v202_v22 = vadd.f32 %v929_v20, %v1206_v37  ;;  %v193_v23 = vpop.f32.mrb[15].mxu0 }
  0xfb   :  { %v217_v24 = vmax.f32 %v191_v19, 0.0  ;;  %v194_v25 = vadd.f32 %v1206_v37, %v193_v23  ;;  %998 = vmatpush3.bf16.msra.mxu1 %v1191_v35 }
  0xfc   :  { %v220_v26 = vmax.f32 %v202_v22, 0.0  ;;  %991 = vmatprep.subr.bf16.mxu1 %v1198_v36 }
  0xfd   :  { %v218_v27 = vmax.f32 %v194_v25, 0.0  ;;  %v1044_v25 = vmov 0  }
  0xfe   :  { %v228_v28 = vpack.c.bf16 %v220_v26, %v219_v21  ;;  %1004 = vset.pattern.permute.xlu1 %v1044_v25  ;;  %1005 = vset.pattern.permute.xlu0 %v1044_v25  ;;  %v1250_v26 = vld [vmem:[%s1381_s6] ss:$0 sm:$0xff]  ;;  %s1045_s6 = smov [#allocation3]  }
  0xff   :  { %v227_v29 = vpack.c.bf16 %v218_v27, %v217_v24  ;;  %999 = vmatpush3.bf16.msra.mxu1 %v1198_v36 }
 0x100   :  { %992 = vmatprep.subr.bf16.mxu1 %v1018_v30 }
 0x101   :  { %950 = vmatprep.mubr.msk.bf16.mxu1 %vm268_vm1, %v227_v29 }
 0x102   :  { %951 = vmatmul.mubr.msk.bf16.gmra.mrb[12].mxu1 %vm268_vm1, %v228_v28 }
 0x103   :  { %1000 = vmatpush3.bf16.msra.mxu1 %v1018_v30 }
 0x104   :  { %993 = vmatprep.subr.bf16.mxu1 %v1019_v31 }
 0x107   :  { %1001 = vmatpush3.bf16.msra.mxu1 %v1019_v31 }
 0x1bd   :  { %v940_v33 = vpop.f32.mrb[0].mxu1 }
 0x1be   :  { %v336_v34 = vadd.f32 %v940_v33, %v849_v32  ;;  %v327_v35 = vpop.f32.mrb[1].mxu1 }
 0x1bf   :  { %v328_v36 = vadd.f32 %v849_v32, %v327_v35  ;;  %v941_v37 = vpop.f32.mrb[2].mxu1 }
 0x1c0   :  { %v339_v38 = vadd.f32 %v941_v37, %v849_v32  ;;  %v330_v39 = vpop.f32.mrb[3].mxu1  ;;  %v392_v41 = vmax.f32 %v336_v34, 0.0 }
 0x1c1   :  { %v331_v40 = vadd.f32 %v849_v32, %v330_v39  ;;  %v390_v43 = vmax.f32 %v328_v36, 0.0 }
 0x1c2   :  { %v393_v42 = vmax.f32 %v339_v38, 0.0 }
 0x1c3   :  { %v391_v44 = vmax.f32 %v331_v40, 0.0 }
 0x1c4   :  { %v407_v45 = vpack.c.bf16 %v393_v42, %v392_v41 }
 0x1c5   :  { %v406_v46 = vpack.c.bf16 %v391_v44, %v390_v43  ;;  %v944_v47 = vpop.f32.mrb[4].mxu1 }
 0x1c6   :  { %v352_v48 = vadd.f32 %v944_v47, %v849_v32  ;;  %v343_v49 = vpop.f32.mrb[5].mxu1 }
 0x1c7   :  { %v344_v50 = vadd.f32 %v849_v32, %v343_v49  ;;  %v945_v51 = vpop.f32.mrb[6].mxu1  ;;  %970 = vmatprep.mubr.bf16.mxu0 %v406_v46 }
 0x1c8   :  { %v355_v52 = vadd.f32 %v945_v51, %v849_v32  ;;  %v346_v53 = vpop.f32.mrb[7].mxu1  ;;  %971 = vmatmul.mubr.bf16.vlgmr.msra.gmra.mrb[16].mxu0 %v407_v45  ;;  %v396_v55 = vmax.f32 %v352_v48, 0.0 }
 0x1c9   :  { %v347_v54 = vadd.f32 %v849_v32, %v346_v53  ;;  %v394_v57 = vmax.f32 %v344_v50, 0.0 }
 0x1ca   :  { %v397_v56 = vmax.f32 %v355_v52, 0.0 }
 0x1cb   :  { %v395_v58 = vmax.f32 %v347_v54, 0.0 }
 0x1cc   :  { %v409_v59 = vpack.c.bf16 %v397_v56, %v396_v55 }
 0x1cd   :  { %v408_v60 = vpack.c.bf16 %v395_v58, %v394_v57  ;;  %v948_v61 = vpop.f32.mrb[8].mxu1 }
 0x1ce   :  { %v368_v62 = vadd.f32 %v948_v61, %v849_v32  ;;  %v359_v63 = vpop.f32.mrb[9].mxu1 }
 0x1cf   :  { %974 = vmatprep.mubr.bf16.mxu0 %v408_v60  ;;  %v360_v0 = vadd.f32 %v849_v32, %v359_v63  ;;  %v949_v1 = vpop.f32.mrb[10].mxu1 }
 0x1d0   :  { %975 = vmatmul.mubr.bf16.gmra.mrb[20].mxu0 %v409_v59  ;;  %v400_v2 = vmax.f32 %v368_v62, 0.0  ;;  %v371_v3 = vadd.f32 %v949_v1, %v849_v32  ;;  %v362_v4 = vpop.f32.mrb[11].mxu1 }
 0x1d1   :  { %v398_v5 = vmax.f32 %v360_v0, 0.0  ;;  %v363_v6 = vadd.f32 %v849_v32, %v362_v4 }
 0x1d2   :  { %v401_v7 = vmax.f32 %v371_v3, 0.0 }
 0x1d3   :  { %v399_v8 = vmax.f32 %v363_v6, 0.0 }
 0x1d4   :  { %v411_v9 = vpack.c.bf16 %v401_v7, %v400_v2 }
 0x1d5   :  { %v410_v10 = vpack.c.bf16 %v399_v8, %v398_v5  ;;  %v952_v11 = vpop.f32.mrb[12].mxu1 }
 0x1d6   :  { %v384_v12 = vadd.f32 %v952_v11, %v849_v32  ;;  %v375_v13 = vpop.f32.mrb[13].mxu1 }
 0x1d7   :  { %978 = vmatprep.mubr.bf16.mxu0 %v410_v10  ;;  %v376_v14 = vadd.f32 %v849_v32, %v375_v13  ;;  %v953_v15 = vpop.f32.mrb[14].mxu1 }
 0x1d8   :  { %979 = vmatmul.mubr.bf16.gmra.mrb[24].mxu0 %v411_v9  ;;  %v404_v16 = vmax.f32 %v384_v12, 0.0  ;;  %v387_v17 = vadd.f32 %v953_v15, %v849_v32  ;;  %v378_v18 = vpop.f32.mrb[15].mxu1 }
 0x1d9   :  { %v402_v19 = vmax.f32 %v376_v14, 0.0  ;;  %v379_v20 = vadd.f32 %v849_v32, %v378_v18  ;;  %v1257_v32 = vld [vmem:[%s1382_s7] ss:$0 sm:$0xff]  ;;  %s830_s7 = sshll.u32 %s1045_s6, 4  ;;  %s831_s7 = int_to_ptr.vmem [resolvable:$true] %s830_s7 }
 0x1da   :  { %v405_v21 = vmax.f32 %v387_v17, 0.0  ;;  %s1020_s26 = scalar_lea.vmem %s831_s7, 16  ;;  %s1024_s27 = scalar_lea.vmem %s831_s7, 32 }
 0x1db   :  { %v403_v22 = vmax.f32 %v379_v20, 0.0  ;;  %p1021_p0 = scmp.ne.s32.totalorder %s831_s7, %s1020_s26  ;;  %p1025_p1 = scmp.lt.s32.totalorder %s831_s7, %s831_s7 }
 0x1dc   :  { %v413_v23 = vpack.c.bf16 %v405_v21, %v404_v16  ;;  %p1026_p2 = scmp.lt.s32.totalorder %s1024_s27, %s1020_s26 }
 0x1dd   :  { %v412_v24 = vpack.c.bf16 %v403_v22, %v402_v19 }
 0x1de   :  { %p1027_p3 = por %p1026_p2, %p1025_p1 }
 0x1df   :  { %982 = vmatprep.mubr.bf16.mxu1 %v412_v24 }
 0x1e0   :  { %983 = vmatmul.mubr.bf16.vlgmr.msra.gmra.mrb[16].mxu1 %v413_v23  ;;  %p1028_p4 = pnand %p1027_p3, %p1021_p0 }
 0x29b   :  { %v972_v27 = vpop.f32.mrb[16].mxu0 }
 0x29c   :  { %v528_v28 = vadd.f32 %v972_v27, %v1250_v26  ;;  %v519_v29 = vpop.f32.mrb[17].mxu0 }
 0x29d   :  { %v520_v30 = vadd.f32 %v1250_v26, %v519_v29  ;;  %v973_v31 = vpop.f32.mrb[18].mxu0 }
 0x29e   :  { %v584_v33 = vmax.f32 %v528_v28, 0.0  ;;  %v531_v34 = vadd.f32 %v973_v31, %v1250_v26  ;;  %v522_v35 = vpop.f32.mrb[19].mxu0 }
 0x29f   :  { %v582_v36 = vmax.f32 %v520_v30, 0.0  ;;  %v523_v37 = vadd.f32 %v1250_v26, %v522_v35  ;;  %v669_v30 = vld [vmem:[#allocation2] sm:$0x1] }
 0x2a0   :  { %v585_v38 = vmax.f32 %v531_v34, 0.0  ;;  %v607_v39 = vmul.f32 %v1257_v32, %v584_v33 }
 0x2a1   :  { %v583_v40 = vmax.f32 %v523_v37, 0.0  ;;  %v605_v41 = vmul.f32 %v1257_v32, %v582_v36 }
 0x2a2   :  { %v627_v42 = vsel %vm268_vm1, %v607_v39, 0.0  ;;  %v608_v43 = vmul.f32 %v1257_v32, %v585_v38 }
 0x2a3   :  { %628 = vadd.xlane.f32.xlu1 %v627_v42  ;;  %v976_v44 = vpop.f32.mrb[20].mxu0  ;;  %v621_v45 = vsel %vm268_vm1, %v605_v41, 0.0  ;;  %v606_v46 = vmul.f32 %v1257_v32, %v583_v40 }
 0x2a4   :  { %v544_v47 = vadd.f32 %v976_v44, %v1250_v26  ;;  %v535_v48 = vpop.f32.mrb[21].mxu0  ;;  %622 = vadd.xlane.f32.xlu0 %v621_v45  ;;  %v630_v53 = vsel %vm268_vm1, %v608_v43, 0.0 }
 0x2a5   :  { %v536_v49 = vadd.f32 %v1250_v26, %v535_v48  ;;  %v977_v50 = vpop.f32.mrb[22].mxu0  ;;  %v624_v57 = vsel %vm268_vm1, %v606_v46, 0.0 }
 0x2a6   :  { %v588_v51 = vmax.f32 %v544_v47, 0.0  ;;  %v538_v52 = vpop.f32.mrb[23].mxu0  ;;  %v547_v55 = vadd.f32 %v977_v50, %v1250_v26 }
 0x2a7   :  { %v586_v54 = vmax.f32 %v536_v49, 0.0  ;;  %v539_v56 = vadd.f32 %v1250_v26, %v538_v52  ;;  %631 = vadd.xlane.f32.xlu1 %v630_v53  ;;  %v675_v52 = vlaneseq }
 0x2a8   :  { %625 = vadd.xlane.f32.xlu0 %v624_v57  ;;  %v611_v58 = vmul.f32 %v1257_v32, %v588_v51  ;;  %v589_v61 = vmax.f32 %v547_v55, 0.0 }
 0x2a9   :  { %v587_v59 = vmax.f32 %v539_v56, 0.0  ;;  %v609_v0 = vmul.f32 %v1257_v32, %v586_v54  ;;  %v1305_v55 = vshrl.u32 %v675_v52, 7  ;;  %v1308_v56 = vand.u32 127, %v675_v52 }
 0x2aa   :  { %v639_v60 = vsel %vm268_vm1, %v611_v58, 0.0  ;;  %v612_v10 = vmul.f32 %v1257_v32, %v589_v61 }
 0x2ab   :  { %v610_v62 = vmul.f32 %v1257_v32, %v587_v59  ;;  %v980_v63 = vpop.f32.mrb[24].mxu0  ;;  %v633_v9 = vsel %vm268_vm1, %v609_v0, 0.0  ;;  %v724_v61 = vadd.s32 4294967280, %v1308_v56 }
 0x2ac   :  { %640 = vadd.xlane.f32.xlu0 %v639_v60  ;;  %v560_v1 = vadd.f32 %v980_v63, %v1250_v26  ;;  %v551_v2 = vpop.f32.mrb[25].mxu0  ;;  %v642_v16 = vsel %vm268_vm1, %v612_v10, 0.0  ;;  %v717_v60 = vadd.s32 4294967288, %v1308_v56  ;;  %v738_v10 = vadd.s32 4294967264, %v1308_v56 }
 0x2ad   :  { %v636_v3 = vsel %vm268_vm1, %v610_v62, 0.0  ;;  %v552_v4 = vadd.f32 %v1250_v26, %v551_v2  ;;  %v981_v5 = vpop.f32.mrb[26].mxu0 }
 0x2ae   :  { %637 = vadd.xlane.f32.xlu1 %v636_v3  ;;  %v592_v6 = vmax.f32 %v560_v1, 0.0  ;;  %v563_v7 = vadd.f32 %v981_v5, %v1250_v26  ;;  %v554_v8 = vpop.f32.mrb[27].mxu0  ;;  %v715_v1 = vsub.s32 %v1308_v56, %v1305_v55  ;;  %v720_v2 = vsub.s32 %v717_v60, %v1305_v55 }
 0x2af   :  { %v590_v12 = vmax.f32 %v552_v4, 0.0  ;;  %v555_v13 = vadd.f32 %v1250_v26, %v554_v8  ;;  %v727_v4 = vsub.s32 %v724_v61, %v1305_v55 }
 0x2b0   :  { %634 = vadd.xlane.f32.xlu0 %v633_v9  ;;  %v593_v11 = vmax.f32 %v563_v7, 0.0  ;;  %v615_v14 = vmul.f32 %v1257_v32, %v592_v6  ;;  %v731_v7 = vadd.s32 4294967272, %v1308_v56 }
 0x2b1   :  { %v591_v19 = vmax.f32 %v555_v13, 0.0  ;;  %v613_v22 = vmul.f32 %v1257_v32, %v590_v12 }
 0x2b2   :  { %v616_v15 = vmul.f32 %v1257_v32, %v593_v11  ;;  %v651_v20 = vsel %vm268_vm1, %v615_v14, 0.0  ;;  %v734_v13 = vsub.s32 %v731_v7, %v1305_v55  ;;  %v745_v14 = vadd.s32 4294967256, %v1308_v56 }
 0x2b3   :  { %v984_v17 = vpop.f32.mrb[16].mxu1  ;;  %v645_v27 = vsel %vm268_vm1, %v613_v22, 0.0  ;;  %v614_v29 = vmul.f32 %v1257_v32, %v591_v19 }
 0x2b4   :  { %643 = vadd.xlane.f32.xlu0 %v642_v16  ;;  %v567_v18 = vpop.f32.mrb[17].mxu1  ;;  %v576_v21 = vadd.f32 %v984_v17, %v1250_v26  ;;  %v741_v17 = vsub.s32 %v738_v10, %v1305_v55 }
 0x2b5   :  { %v985_v23 = vpop.f32.mrb[18].mxu1  ;;  %v568_v28 = vadd.f32 %v1250_v26, %v567_v18  ;;  %v648_v33 = vsel %vm268_vm1, %v614_v29, 0.0 }
 0x2b6   :  { %v570_v24 = vpop.f32.mrb[19].mxu1  ;;  %v596_v25 = vmax.f32 %v576_v21, 0.0  ;;  %v579_v36 = vadd.f32 %v985_v23, %v1250_v26  ;;  %v748_v23 = vsub.s32 %v745_v14, %v1305_v55 }
 0x2b7   :  { %v594_v31 = vmax.f32 %v568_v28, 0.0  ;;  %v571_v34 = vadd.f32 %v1250_v26, %v570_v24  ;;  %v654_v26 = vsel %vm268_vm1, %v616_v15, 0.0 }
 0x2b8   :  { %652 = vadd.xlane.f32.xlu0 %v651_v20  ;;  %v619_v35 = vmul.f32 %v1257_v32, %v596_v25  ;;  %v597_v40 = vmax.f32 %v579_v36, 0.0  ;;  %v752_v20 = vadd.s32 4294967248, %v1308_v56 }
 0x2b9   :  { %v595_v37 = vmax.f32 %v571_v34, 0.0  ;;  %v617_v39 = vmul.f32 %v1257_v32, %v594_v31  ;;  %v773_v34 = vadd.s32 4294967224, %v1308_v56 }
 0x2ba   :  { %v663_v38 = vsel %vm268_vm1, %v619_v35, 0.0  ;;  %v620_v44 = vmul.f32 %v1257_v32, %v597_v40  ;;  %v755_v25 = vsub.s32 %v752_v20, %v1305_v55 }
 0x2bb   :  { %v657_v41 = vsel %vm268_vm1, %v617_v39, 0.0  ;;  %v618_v42 = vmul.f32 %v1257_v32, %v595_v37  ;;  %v677_v32 = vsub.s32 0, %v1305_v55 }
 0x2bc   :  { %646 = vadd.xlane.f32.xlu0 %v645_v27  ;;  %v666_v45 = vsel %vm268_vm1, %v620_v44, 0.0  ;;  %v759_v27 = vadd.s32 4294967240, %v1308_v56  ;;  %v780_v44 = vadd.s32 4294967216, %v1308_v56 }
 0x2bd   :  { %v660_v43 = vsel %vm268_vm1, %v618_v42, 0.0 }
 0x2be   :  { %v762_v36 = vsub.s32 %v759_v27, %v1305_v55  ;;  %v783_v52 = vsub.s32 %v780_v44, %v1305_v55 }
 0x2bf   :  { %672 = vperm.xlu1 %1004, %v669_v30   ;;  %v766_v30 = vadd.s32 4294967232, %v1308_v56 }
 0x2c0   :  { %649 = vadd.xlane.f32.xlu0 %v648_v33 }
 0x2c1   :  { %v769_v39 = vsub.s32 %v766_v30, %v1305_v55 }
 0x2c4   :  { %664 = vadd.xlane.f32.xlu0 %v663_v38 }
 0x2c8   :  { %658 = vadd.xlane.f32.xlu0 %v657_v41  ;;  %v776_v41 = vsub.s32 %v773_v34, %v1305_v55 }
 0x2cc   :  { %661 = vadd.xlane.f32.xlu0 %v660_v43 }
 0x2d0   :  { %667 = vadd.xlane.f32.xlu0 %v666_v45 }
 0x2e3   :  { %655 = vadd.xlane.f32.xlu1 %v654_v26 }
 0x330   :  { %v629_v49 = vpop.xlane.xlu1 %628 }
 0x331   :  { %v623_v46 = vpop.xlane.xlu0 %622 }
 0x334   :  { %v632_v51 = vpop.xlane.xlu1 %631 }
 0x335   :  { %v626_v47 = vpop.xlane.xlu0 %625 }
 0x339   :  { %v641_v48 = vpop.xlane.xlu0 %640 }
 0x33b   :  { %v638_v53 = vpop.xlane.xlu1 %637 }
 0x33d   :  { %v635_v50 = vpop.xlane.xlu0 %634 }
 0x33f   :  { %v673_v57 = vpop.permute.xlu1 %672 }
 0x340   :  { %v1312_v59 = vrot.slane %v673_v57, %v677_v32  ;;  %v815_v32 = vadd.s32 4294967176, %v1308_v56 }
 0x341   :  { %v644_v54 = vpop.xlane.xlu0 %643 }
 0x342   :  { %v679_v63 = vadd.f32 %v1312_v59, %v623_v46  ;;  %v680_v0 = vadd.f32 %v1312_v59, %v626_v47  ;;  %v681_v3 = vadd.f32 %v1312_v59, %v629_v49  ;;  %v682_v11 = vadd.f32 %v1312_v59, %v632_v51 }
 0x343   :  { %v683_v15 = vadd.f32 %v1312_v59, %v635_v50  ;;  %v684_v21 = vadd.f32 %v1312_v59, %v638_v53  ;;  %v685_v28 = vadd.f32 %v1312_v59, %v641_v48  ;;  %v686_v37 = vadd.f32 %v1312_v59, %v644_v54 }
 0x344   :  { %v716_v5 = vrot.slane %v679_v63, %v715_v1  ;;  %v721_v6 = vrot.slane %v680_v0, %v720_v2  ;;  %v728_v9 = vrot.slane %v681_v3, %v727_v4  ;;  %v735_v19 = vrot.slane %v682_v11, %v734_v13 }
 0x345   :  { %v1310_v58 = vpop.xlane.xlu0 %652  ;;  %v742_v24 = vrot.slane %v683_v15, %v741_v17  ;;  %v749_v33 = vrot.slane %v684_v21, %v748_v23  ;;  %v756_v38 = vrot.slane %v685_v28, %v755_v25  ;;  %v763_v26 = vrot.slane %v686_v37, %v762_v36 }
 0x346   :  { %v723_v12 = vsel %vm722_vm2, %v721_v6, %v716_v5  ;;  %v787_v46 = vadd.s32 4294967208, %v1308_v56  ;;  %v794_v48 = vadd.s32 4294967200, %v1308_v56  ;;  %v801_v51 = vadd.s32 4294967192, %v1308_v56 }
 0x347   :  { %v730_v16 = vsel %vm729_vm3, %v728_v9, %v723_v12  ;;  %v689_v53 = vadd.f32 %v1312_v59, %v1310_v58  ;;  %v808_v54 = vadd.s32 4294967184, %v1308_v56  ;;  %v818_v6 = vsub.s32 %v815_v32, %v1305_v55 }
 0x348   :  { %v737_v22 = vsel %vm736_vm4, %v735_v19, %v730_v16  ;;  %v790_v57 = vsub.s32 %v787_v46, %v1305_v55  ;;  %v797_v61 = vsub.s32 %v794_v48, %v1305_v55  ;;  %v804_v2 = vsub.s32 %v801_v51, %v1305_v55 }
 0x349   :  { %v647_v62 = vpop.xlane.xlu0 %646  ;;  %v744_v29 = vsel %vm743_vm5, %v742_v24, %v737_v22  ;;  %v784_v4 = vrot.slane %v689_v53, %v783_v52  ;;  %v811_v56 = vsub.s32 %v808_v54, %v1305_v55 }
 0x34a   :  { %v751_v35 = vsel %vm750_vm6, %v749_v33, %v744_v29  ;;  %v687_v40 = vadd.f32 %v1312_v59, %v647_v62 }
 0x34b   :  { %v758_v43 = vsel %vm757_vm7, %v756_v38, %v751_v35 }
 0x34c   :  { %v770_v47 = vrot.slane %v687_v40, %v769_v39  ;;  %v765_v49 = vsel %vm764_vm8, %v763_v26, %v758_v43 }
 0x34d   :  { %v650_v8 = vpop.xlane.xlu0 %649 }
 0x34e   :  { %v688_v42 = vadd.f32 %v1312_v59, %v650_v8  ;;  %v772_v60 = vsel %vm771_vm9, %v770_v47, %v765_v49 }
 0x350   :  { %v777_v50 = vrot.slane %v688_v42, %v776_v41 }
 0x351   :  { %v665_v18 = vpop.xlane.xlu0 %664 }
 0x352   :  { %v779_v1 = vsel %vm778_vm10, %v777_v50, %v772_v60  ;;  %v693_v5 = vadd.f32 %v1312_v59, %v665_v18 }
 0x353   :  { %v786_v10 = vsel %vm785_vm11, %v784_v4, %v779_v1 }
 0x354   :  { %v812_v13 = vrot.slane %v693_v5, %v811_v56 }
 0x355   :  { %v659_v31 = vpop.xlane.xlu0 %658 }
 0x356   :  { %v691_v62 = vadd.f32 %v1312_v59, %v659_v31 }
 0x358   :  { %v798_v9 = vrot.slane %v691_v62, %v797_v61 }
 0x359   :  { %v662_v45 = vpop.xlane.xlu0 %661 }
 0x35a   :  { %v692_v58 = vadd.f32 %v1312_v59, %v662_v45 }
 0x35c   :  { %v805_v11 = vrot.slane %v692_v58, %v804_v2 }
 0x35d   :  { %v668_v63 = vpop.xlane.xlu0 %667 }
 0x35e   :  { %v694_v7 = vadd.f32 %v1312_v59, %v668_v63 }
 0x360   :  { %v819_v15 = vrot.slane %v694_v7, %v818_v6 }
 0x370   :  { %v656_v0 = vpop.xlane.xlu1 %655 }
 0x371   :  { %v690_v3 = vadd.f32 %v1312_v59, %v656_v0 }
 0x373   :  { %v791_v8 = vrot.slane %v690_v3, %v790_v57 }
 0x375   :  { %v793_v12 = vsel %vm792_vm12, %v791_v8, %v786_v10 }
 0x376   :  { %v800_v14 = vsel %vm799_vm13, %v798_v9, %v793_v12 }
 0x377   :  { %v807_v16 = vsel %vm806_vm14, %v805_v11, %v800_v14 }
 0x378   :  { %v814_v17 = vsel %vm813_vm15, %v812_v13, %v807_v16 }
 0x379   :  { %v821_v55 = vsel %vm820_vm0, %v819_v15, %v814_v17 }
 0x37a   :  { %823 = vst [vmem:[#allocation3] sm:$0x1] %v821_v55 }
 0x37b   :  { %1031 = shalt.err (!%p1028_p4)
}
 0x37c   :  { %s1032_s30 = scalar_lea.hbm %s1384_s9, 16 }
 0x37d   :  { %p1033_p5 = scmp.ne.s32.totalorder %s1384_s9, %s1032_s30  ;;  %p1036_p6 = scmp.lt.u32.totalorder %s1032_s30, %s1384_s9 }
 0x37f   :  { %p1038_p7 = pnand %p1036_p6, %p1033_p5 }
 0x381   :  { %1041 = shalt.err (!%p1038_p7)
}
 0x382   :  { %833 = dma.vmem_to_hbm [thread:$0]  %s831_s7, 16, %s1384_s9, [#allocation4]  }
 0x383   :  { %1042 = dma.done.wait [#allocation4], 16  }
 0x384   :  { %1043 = vsyncadd [#allocation4], 4294967280 }
 0x385   :  { %837 = vsyncpa [#allocation4], 1 }

</bundles_post_ra>
